<compile_context>
chip_gen: v6e
topology: v6e:2x2x1
jax: 0.10.0
libtpu: 0.0.40
codegen_flags: <defaults>
</compile_context>

<pallas_src>
from functools import partial

import jax
import jax.numpy as jnp
from jax.experimental import pallas as pl
from jax.experimental.pallas import tpu as pltpu


def _round_up(v, m):
    return (v + m - 1) // m * m


def _vmem_limit_bytes(C, HW, KK, OCp, L):
    """Real double/single-buffer footprint + live-value headroom, per-gen cap."""
    try:
        total = pltpu.get_tpu_info().vmem_capacity_bytes
    except Exception:
        total = 64 * 2 ** 20                       # assume v7x-class (64 MiB/TC)
    cap = 100 * 2 ** 20 if total >= 100 * 2 ** 20 else 40 * 2 ** 20
    est = (
        2 * _round_up(C, 8) * _round_up(HW, 128) * 4        # x block, double-buffered f32
        + KK * _round_up(OCp, 16) * _round_up(C, 128) * 2   # weight, single-buffered bf16
        + _round_up(OCp, 8) * 128 * 4                       # bias, single-buffered f32
        + 2 * _round_up(OCp, 16) * _round_up(L, 128) * 2    # out block, double-buffered bf16
        + 2 * _round_up(OCp, 8) * _round_up(L, 128) * 4     # live f32 acc + tap product
        + _round_up(C, 16) * _round_up(HW, 128) * 2         # live x value
    )
    return int(min(cap, max(16 * 2 ** 20, 2 * est)))


def _masked_conv_kernel(x_ref, w_ref, b_ref, o_ref, *, K, W, L):
    # x_ref: (1, C, H*W)   f32   one image; channels -> sublanes, spatial -> lanes
    # w_ref: (K*K, OCp, C) bf16  mask-folded weight, one (OCp, C) slab per tap
    # b_ref: (OCp, 1)      f32   bias (zero in the OC-padding rows)
    # o_ref: (1, OCp, L)   bf16  L = (Ho-1)*W + Wo : flattened valid output span
    x = x_ref[0]                                            # (C, H*W) f32 in vregs
    acc = None
    for kh in range(K):
        for kw in range(K):
            s = kh * W + kw                                 # static lane shift of this tap
            xs = x[:, s:s + L].astype(jnp.bfloat16)         # (C, L) tap view, bf16 for MXU
            z = jnp.dot(w_ref[kh * K + kw], xs,
                        preferred_element_type=jnp.float32)  # (OCp, L) f32 accumulate
            acc = z if acc is None else acc + z
    y = jnp.maximum(acc + b_ref[...], 0.0)                  # bias + ReLU epilogue (VPU)
    o_ref[0] = y.astype(o_ref.dtype)                        # bf16 writeback


@jax.jit
def random_masked_conv(x, weight, bias, sparsity_ratio, beta, mask_key):
    """Forward pass of RandomMaskedConv with self.type == 1 (stride=1, padding=0)."""
    N, C, H, W = x.shape
    OC, _, K, _ = weight.shape
    Ho, Wo = H - K + 1, W - K + 1
    HW = H * W
    L = (Ho - 1) * W + Wo            # flattened span covering every valid output position
    KK = K * K

    # --- channel mask probabilities (tiny parameter-side math, plain JAX) --------
    channels_l1 = jnp.abs(weight).sum(axis=(0, 2, 3))                   # (C,)
    zexp = jnp.exp(channels_l1 * beta)
    probs = jnp.clip(sparsity_ratio * C * (zexp / zexp.sum()), 0.0, 1.0)
    mask = jax.random.bernoulli(mask_key, probs).astype(weight.dtype)   # (C,)
    # TODO(synk): torch.bernoulli draws from torch's global RNG stream and the module
    # print()s the mask and permanently overwrites conv.weight; here we sample from an
    # explicit jax.random key and return the mask instead of mutating module state.

    # --- fold mask into the weight once; rearrange to per-tap (OCp, C) slabs -----
    OCp = _round_up(max(OC, 1), 16)            # OC lives in sublanes -> pad to 16 only
    w_m = weight * mask.reshape(1, C, 1, 1)                             # (OC, C, K, K)
    w_taps = w_m.transpose(2, 3, 0, 1).reshape(KK, OC, C)               # [kh*K+kw, oc, c]
    w_taps = jnp.pad(w_taps, ((0, 0), (0, OCp - OC), (0, 0))).astype(jnp.bfloat16)
    b2 = jnp.pad(bias, (0, OCp - OC)).reshape(OCp, 1).astype(jnp.float32)

    # --- fused conv + bias + ReLU, one image per grid step (no im2col in HBM) ----
    x2 = x.reshape(N, C, HW)                   # free reshape, stays NCHW / f32
    kern = partial(_masked_conv_kernel, K=K, W=W, L=L)
    out = pl.pallas_call(
        kern,
        out_shape=jax.ShapeDtypeStruct((N, OCp, L), jnp.bfloat16),
        grid_spec=pltpu.PrefetchScalarGridSpec(
            num_scalar_prefetch=0,
            grid=(N,),
            in_specs=[
                # streamed: one image per step (double-buffered by Pallas)
                pl.BlockSpec((1, C, HW), lambda n: (n, 0, 0)),
                # grid-invariant, resident, single-buffered
                pl.BlockSpec((KK, OCp, C), lambda n: (0, 0, 0),
                             pipeline_mode=pl.Buffered(1)),
                pl.BlockSpec((OCp, 1), lambda n: (0, 0),
                             pipeline_mode=pl.Buffered(1)),
            ],
            out_specs=pl.BlockSpec((1, OCp, L), lambda n: (n, 0, 0)),
        ),
        compiler_params=pltpu.CompilerParams(
            dimension_semantics=("parallel",),          # images shard across TCs (v7x)
            vmem_limit_bytes=_vmem_limit_bytes(C, HW, KK, OCp, L),
        ),
    )(x2, w_taps, b2)

    # --- unpack the flattened valid span back to NCHW (single tiny fused pass) ---
    # TODO(synk): if an odd batch N lands on v7x, one TensorCore idles for the last
    # grid step; batching decisions live with the caller.
    y = jnp.pad(out[:, :OC, :], ((0, 0), (0, 0), (0, K - 1)))   # L + K-1 == Ho*W
    y = y.reshape(N, OC, Ho, W)[:, :, :, :Wo].astype(jnp.float32)
    return y, mask


if __name__ == "__main__":
    key = jax.random.PRNGKey(0)
    k_w, k_b, k_x, k_mask = jax.random.split(key, 4)

    in_c, out_c, ksize, beta = 4, 8, 3, 0.5
    sparsity_ratio = 0.5            # nn.Parameter(torch.tensor([0.5])) init value

    # deterministic Conv2d-style init (uniform in +-1/sqrt(fan_in))
    fan_in = in_c * ksize * ksize
    bound = 1.0 / (fan_in ** 0.5)
    weight = jax.random.uniform(k_w, (out_c, in_c, ksize, ksize),
                                jnp.float32, -bound, bound)
    bias = jax.random.uniform(k_b, (out_c,), jnp.float32, -bound, bound)

    x = jax.random.normal(k_x, (2, in_c, 16, 16), jnp.float32)   # NCHW

    y, mask = random_masked_conv(x, weight, bias, sparsity_ratio, beta, k_mask)
    jax.block_until_ready(y)

    # plain-JAX f32 reference with the same sampled mask
    w_m = weight * mask.reshape(1, -1, 1, 1)
    y_ref = jax.lax.conv_general_dilated(
        x, w_m, window_strides=(1, 1), padding="VALID",
        dimension_numbers=("NCHW", "OIHW", "NCHW"))
    y_ref = jnp.maximum(y_ref + bias.reshape(1, -1, 1, 1), 0.0)

    assert y.shape == (2, out_c, 14, 14)
    assert bool(jnp.all(y >= 0.0))                 # ReLU output
    err = float(jnp.max(jnp.abs(y - y_ref)))
    assert bool(jnp.allclose(y, y_ref, rtol=5e-2, atol=8e-2)), err   # bf16 MXU vs f32 ref
    print("KERNEL_OK")
</pallas_src>

<mosaic_0001>
module attributes {stable_mosaic.version = 11 : i64} {
  func.func @_masked_conv_kernel(%arg0: i32, %arg1: memref<1x4x256xf32, #tpu.memory_space<vmem>>, %arg2: memref<9x16x4xbf16, #tpu.memory_space<vmem>>, %arg3: memref<16x1xf32, #tpu.memory_space<vmem>>, %arg4: memref<1x16x222xbf16, #tpu.memory_space<vmem>>) attributes {dimension_semantics = [#tpu.dimension_semantics<parallel>], iteration_bounds = array<i64: 2>, scalar_prefetch = 0 : i64, scratch_operands = 0 : i64, tpu.core_type = #tpu.core_type<tc>, window_params = [{transform_indices = @transform_0, window_bounds = array<i64: 1, 4, 256>}, {pipeline_mode = #tpu.pipeline_mode<synchronous>, transform_indices = @transform_1, window_bounds = array<i64: 9, 16, 4>}, {pipeline_mode = #tpu.pipeline_mode<synchronous>, transform_indices = @transform_2, window_bounds = array<i64: 16, 1>}, {transform_indices = @transform_3, window_bounds = array<i64: 1, 16, 222>}]} {
    %c0 = arith.constant 0 : index
    %c0_0 = arith.constant 0 : index
    %c0_1 = arith.constant 0 : index
    %0 = vector.load %arg1[%c0, %c0_0, %c0_1] : memref<1x4x256xf32, #tpu.memory_space<vmem>>, vector<1x4x256xf32>
    %1 = vector.shape_cast %0 : vector<1x4x256xf32> to vector<4x256xf32>
    %2 = vector.extract_strided_slice %1 {offsets = [0, 0], sizes = [4, 222], strides = [1, 1]} : vector<4x256xf32> to vector<4x222xf32>
    %3 = arith.truncf %2 : vector<4x222xf32> to vector<4x222xbf16>
    %c0_2 = arith.constant 0 : index
    %c0_3 = arith.constant 0 : index
    %c0_4 = arith.constant 0 : index
    %4 = vector.load %arg2[%c0_2, %c0_3, %c0_4] : memref<9x16x4xbf16, #tpu.memory_space<vmem>>, vector<1x16x4xbf16>
    %5 = vector.shape_cast %4 : vector<1x16x4xbf16> to vector<16x4xbf16>
    %cst = arith.constant dense<0.000000e+00> : vector<16x222xf32>
    %6 = tpu.matmul %5, %3, %cst {dimension_numbers = #tpu.dot_dimension_numbers<[1], [0], [0], [1], [0, 0, 1, 1], [], []>} : vector<16x4xbf16>, vector<4x222xbf16>, vector<16x222xf32> -> vector<16x222xf32>
    %7 = vector.extract_strided_slice %1 {offsets = [0, 1], sizes = [4, 222], strides = [1, 1]} : vector<4x256xf32> to vector<4x222xf32>
    %8 = arith.truncf %7 : vector<4x222xf32> to vector<4x222xbf16>
    %c1 = arith.constant 1 : index
    %c0_5 = arith.constant 0 : index
    %c0_6 = arith.constant 0 : index
    %9 = vector.load %arg2[%c1, %c0_5, %c0_6] : memref<9x16x4xbf16, #tpu.memory_space<vmem>>, vector<1x16x4xbf16>
    %10 = vector.shape_cast %9 : vector<1x16x4xbf16> to vector<16x4xbf16>
    %cst_7 = arith.constant dense<0.000000e+00> : vector<16x222xf32>
    %11 = tpu.matmul %10, %8, %cst_7 {dimension_numbers = #tpu.dot_dimension_numbers<[1], [0], [0], [1], [0, 0, 1, 1], [], []>} : vector<16x4xbf16>, vector<4x222xbf16>, vector<16x222xf32> -> vector<16x222xf32>
    %12 = arith.addf %6, %11 : vector<16x222xf32>
    %13 = vector.extract_strided_slice %1 {offsets = [0, 2], sizes = [4, 222], strides = [1, 1]} : vector<4x256xf32> to vector<4x222xf32>
    %14 = arith.truncf %13 : vector<4x222xf32> to vector<4x222xbf16>
    %c2 = arith.constant 2 : index
    %c0_8 = arith.constant 0 : index
    %c0_9 = arith.constant 0 : index
    %15 = vector.load %arg2[%c2, %c0_8, %c0_9] : memref<9x16x4xbf16, #tpu.memory_space<vmem>>, vector<1x16x4xbf16>
    %16 = vector.shape_cast %15 : vector<1x16x4xbf16> to vector<16x4xbf16>
    %cst_10 = arith.constant dense<0.000000e+00> : vector<16x222xf32>
    %17 = tpu.matmul %16, %14, %cst_10 {dimension_numbers = #tpu.dot_dimension_numbers<[1], [0], [0], [1], [0, 0, 1, 1], [], []>} : vector<16x4xbf16>, vector<4x222xbf16>, vector<16x222xf32> -> vector<16x222xf32>
    %18 = arith.addf %12, %17 : vector<16x222xf32>
    %19 = vector.extract_strided_slice %1 {offsets = [0, 16], sizes = [4, 222], strides = [1, 1]} : vector<4x256xf32> to vector<4x222xf32>
    %20 = arith.truncf %19 : vector<4x222xf32> to vector<4x222xbf16>
    %c3 = arith.constant 3 : index
    %c0_11 = arith.constant 0 : index
    %c0_12 = arith.constant 0 : index
    %21 = vector.load %arg2[%c3, %c0_11, %c0_12] : memref<9x16x4xbf16, #tpu.memory_space<vmem>>, vector<1x16x4xbf16>
    %22 = vector.shape_cast %21 : vector<1x16x4xbf16> to vector<16x4xbf16>
    %cst_13 = arith.constant dense<0.000000e+00> : vector<16x222xf32>
    %23 = tpu.matmul %22, %20, %cst_13 {dimension_numbers = #tpu.dot_dimension_numbers<[1], [0], [0], [1], [0, 0, 1, 1], [], []>} : vector<16x4xbf16>, vector<4x222xbf16>, vector<16x222xf32> -> vector<16x222xf32>
    %24 = arith.addf %18, %23 : vector<16x222xf32>
    %25 = vector.extract_strided_slice %1 {offsets = [0, 17], sizes = [4, 222], strides = [1, 1]} : vector<4x256xf32> to vector<4x222xf32>
    %26 = arith.truncf %25 : vector<4x222xf32> to vector<4x222xbf16>
    %c4 = arith.constant 4 : index
    %c0_14 = arith.constant 0 : index
    %c0_15 = arith.constant 0 : index
    %27 = vector.load %arg2[%c4, %c0_14, %c0_15] : memref<9x16x4xbf16, #tpu.memory_space<vmem>>, vector<1x16x4xbf16>
    %28 = vector.shape_cast %27 : vector<1x16x4xbf16> to vector<16x4xbf16>
    %cst_16 = arith.constant dense<0.000000e+00> : vector<16x222xf32>
    %29 = tpu.matmul %28, %26, %cst_16 {dimension_numbers = #tpu.dot_dimension_numbers<[1], [0], [0], [1], [0, 0, 1, 1], [], []>} : vector<16x4xbf16>, vector<4x222xbf16>, vector<16x222xf32> -> vector<16x222xf32>
    %30 = arith.addf %24, %29 : vector<16x222xf32>
    %31 = vector.extract_strided_slice %1 {offsets = [0, 18], sizes = [4, 222], strides = [1, 1]} : vector<4x256xf32> to vector<4x222xf32>
    %32 = arith.truncf %31 : vector<4x222xf32> to vector<4x222xbf16>
    %c5 = arith.constant 5 : index
    %c0_17 = arith.constant 0 : index
    %c0_18 = arith.constant 0 : index
    %33 = vector.load %arg2[%c5, %c0_17, %c0_18] : memref<9x16x4xbf16, #tpu.memory_space<vmem>>, vector<1x16x4xbf16>
    %34 = vector.shape_cast %33 : vector<1x16x4xbf16> to vector<16x4xbf16>
    %cst_19 = arith.constant dense<0.000000e+00> : vector<16x222xf32>
    %35 = tpu.matmul %34, %32, %cst_19 {dimension_numbers = #tpu.dot_dimension_numbers<[1], [0], [0], [1], [0, 0, 1, 1], [], []>} : vector<16x4xbf16>, vector<4x222xbf16>, vector<16x222xf32> -> vector<16x222xf32>
    %36 = arith.addf %30, %35 : vector<16x222xf32>
    %37 = vector.extract_strided_slice %1 {offsets = [0, 32], sizes = [4, 222], strides = [1, 1]} : vector<4x256xf32> to vector<4x222xf32>
    %38 = arith.truncf %37 : vector<4x222xf32> to vector<4x222xbf16>
    %c6 = arith.constant 6 : index
    %c0_20 = arith.constant 0 : index
    %c0_21 = arith.constant 0 : index
    %39 = vector.load %arg2[%c6, %c0_20, %c0_21] : memref<9x16x4xbf16, #tpu.memory_space<vmem>>, vector<1x16x4xbf16>
    %40 = vector.shape_cast %39 : vector<1x16x4xbf16> to vector<16x4xbf16>
    %cst_22 = arith.constant dense<0.000000e+00> : vector<16x222xf32>
    %41 = tpu.matmul %40, %38, %cst_22 {dimension_numbers = #tpu.dot_dimension_numbers<[1], [0], [0], [1], [0, 0, 1, 1], [], []>} : vector<16x4xbf16>, vector<4x222xbf16>, vector<16x222xf32> -> vector<16x222xf32>
    %42 = arith.addf %36, %41 : vector<16x222xf32>
    %43 = vector.extract_strided_slice %1 {offsets = [0, 33], sizes = [4, 222], strides = [1, 1]} : vector<4x256xf32> to vector<4x222xf32>
    %44 = arith.truncf %43 : vector<4x222xf32> to vector<4x222xbf16>
    %c7 = arith.constant 7 : index
    %c0_23 = arith.constant 0 : index
    %c0_24 = arith.constant 0 : index
    %45 = vector.load %arg2[%c7, %c0_23, %c0_24] : memref<9x16x4xbf16, #tpu.memory_space<vmem>>, vector<1x16x4xbf16>
    %46 = vector.shape_cast %45 : vector<1x16x4xbf16> to vector<16x4xbf16>
    %cst_25 = arith.constant dense<0.000000e+00> : vector<16x222xf32>
    %47 = tpu.matmul %46, %44, %cst_25 {dimension_numbers = #tpu.dot_dimension_numbers<[1], [0], [0], [1], [0, 0, 1, 1], [], []>} : vector<16x4xbf16>, vector<4x222xbf16>, vector<16x222xf32> -> vector<16x222xf32>
    %48 = arith.addf %42, %47 : vector<16x222xf32>
    %49 = vector.extract_strided_slice %1 {offsets = [0, 34], sizes = [4, 222], strides = [1, 1]} : vector<4x256xf32> to vector<4x222xf32>
    %50 = arith.truncf %49 : vector<4x222xf32> to vector<4x222xbf16>
    %c8 = arith.constant 8 : index
    %c0_26 = arith.constant 0 : index
    %c0_27 = arith.constant 0 : index
    %51 = vector.load %arg2[%c8, %c0_26, %c0_27] : memref<9x16x4xbf16, #tpu.memory_space<vmem>>, vector<1x16x4xbf16>
    %52 = vector.shape_cast %51 : vector<1x16x4xbf16> to vector<16x4xbf16>
    %cst_28 = arith.constant dense<0.000000e+00> : vector<16x222xf32>
    %53 = tpu.matmul %52, %50, %cst_28 {dimension_numbers = #tpu.dot_dimension_numbers<[1], [0], [0], [1], [0, 0, 1, 1], [], []>} : vector<16x4xbf16>, vector<4x222xbf16>, vector<16x222xf32> -> vector<16x222xf32>
    %54 = arith.addf %48, %53 : vector<16x222xf32>
    %c0_29 = arith.constant 0 : index
    %c0_30 = arith.constant 0 : index
    %55 = vector.load %arg3[%c0_29, %c0_30] : memref<16x1xf32, #tpu.memory_space<vmem>>, vector<16x1xf32>
    %56 = vector.broadcast %55 : vector<16x1xf32> to vector<16x222xf32>
    %57 = arith.addf %54, %56 : vector<16x222xf32>
    %cst_31 = arith.constant 0.000000e+00 : f32
    %58 = vector.broadcast %cst_31 : f32 to vector<16x222xf32>
    %59 = arith.maximumf %57, %58 : vector<16x222xf32>
    %60 = arith.truncf %59 : vector<16x222xf32> to vector<16x222xbf16>
    %c0_32 = arith.constant 0 : index
    %c0_33 = arith.constant 0 : index
    %c0_34 = arith.constant 0 : index
    %61 = vector.load %arg4[%c0_32, %c0_33, %c0_34] : memref<1x16x222xbf16, #tpu.memory_space<vmem>>, vector<1x16x222xbf16>
    %62 = vector.shape_cast %61 : vector<1x16x222xbf16> to vector<16x222xbf16>
    %63 = vector.shape_cast %60 : vector<16x222xbf16> to vector<1x16x222xbf16>
    tpu.vector_store %arg4[%c0_32, %c0_33, %c0_34], %63 {strides = array<i32>} : memref<1x16x222xbf16, #tpu.memory_space<vmem>>, vector<1x16x222xbf16>,
    return
  }
  func.func @transform_0(%arg0: i32) -> (i32, i32, i32) {
    %c0_i32 = arith.constant 0 : i32
    %c0_i32_0 = arith.constant 0 : i32
    %c0_i32_1 = arith.constant 0 : i32
    return %arg0, %c0_i32, %c0_i32_0 : i32, i32, i32
  }
  func.func @transform_1(%arg0: i32) -> (i32, i32, i32) {
    %c0_i32 = arith.constant 0 : i32
    %c0_i32_0 = arith.constant 0 : i32
    %c0_i32_1 = arith.constant 0 : i32
    %c0_i32_2 = arith.constant 0 : i32
    return %c0_i32, %c0_i32_0, %c0_i32_1 : i32, i32, i32
  }
  func.func @transform_2(%arg0: i32) -> (i32, i32) {
    %c0_i32 = arith.constant 0 : i32
    %c0_i32_0 = arith.constant 0 : i32
    %c0_i32_1 = arith.constant 0 : i32
    return %c0_i32, %c0_i32_0 : i32, i32
  }
  func.func @transform_3(%arg0: i32) -> (i32, i32, i32) {
    %c0_i32 = arith.constant 0 : i32
    %c0_i32_0 = arith.constant 0 : i32
    %c0_i32_1 = arith.constant 0 : i32
    return %arg0, %c0_i32, %c0_i32_0 : i32, i32, i32
  }
}

</mosaic_0001>

<bundles_post_ra>
// kernel: random_masked_conv.1
= control target key start
LH: loop header
LB: loop body
LE: loop exit
PB: predicated region body
PF: predicated region fallthrough
CT: control target
= control target key end

     0   :  { %s1015_s12 = smov 0   ;;  %s1107_s0 = inlined_call_operand.vmem [shape: f32[2,4,256], index: 0, kind: input, shape index: {}]   ;;  %s1108_s1 = inlined_call_operand.vmem [shape: bf16[9,16,4], index: 1, kind: input, shape index: {}]   ;;  %s1109_s2 = inlined_call_operand.vmem [shape: f32[16,1], index: 2, kind: input, shape index: {}]   ;;  %s1110_s3 = inlined_call_operand.vmem [shape: bf16[2,16,222], index: 3, kind: output, shape index: {}]  }
   0x1 LB: > { %s889_s13 = sadd.s32 4294967295, %s984_s12   ;;  %p893_p0 = scmp.ge.s32.totalorder %s984_s12, 1  ;;  %s984_s12 = sphi %s1015_s12, %s13_s12  }
   0x2   : > { %p137_p1 = scmp.lt.s32.totalorder %s984_s12, 3 }
   0x4   : > { %p138_p2 = pnand %p893_p0, %p137_p1 }
   0x5   : > { %p161_p3 = scmp.lt.s32.totalorder (!%p138_p2), %s889_s13, 1  ;;  %s987_s18 = smov (!%p138_p2), 126  }
   0x6   : > { %141 = sbr.rel (%p138_p2) target bundleno = 381 (0x17d), region = 32  ;;  %s988_s19 = smov (!%p138_p2), 127  }
   0x7   : > { %s989_s22 = smov (!%p138_p2), 112   ;;  %s990_s23 = smov (!%p138_p2), 111  }
   0x8   : > { %s991_s24 = smov (!%p138_p2), 110   ;;  %s992_s25 = smov (!%p138_p2), 96  }
   0x9   : > { %s993_s26 = smov (!%p138_p2), 95   ;;  %s994_s27 = smov (!%p138_p2), 94  }
   0xb   : > { %s1112_s13 = smov (!%p161_p3, %s889_s13), 1  ;;  %v986_v0 = vmov 0   ;;  %vm200_vm0 = vcmask 1041408   ;;  %v970_v6 = vld [vmem:[%s1108_s1] sm:$0xff]   ;;  %vm196_vm1 = vcmask 31744   ;;  %v798_v8 = vld [vmem:[%s1109_s2 + $0x8] sm:$0xff] }
   0xc   : > { %239 = vmatprep.mubr.bf16.mxu0 %v986_v0  ;;  %296 = vmatprep.mubr.bf16.mxu1 %v986_v0  ;;  %s945_s14 = sshll.u32 %s1112_s13, 3  ;;  %v797_v7 = vld [vmem:[%s1109_s2] sm:$0xff]  ;;  %vm319_vm2 = vcmask 1031168   ;;  %vm194_vm3 = vcmask 1039360   ;;  %v969_v16 = vld [vmem:[%s1108_s1 + $0x8] sm:$0xff]   ;;  %vm389_vm4 = vcmask 916480  }
   0xd   : > { %966 = vset.pattern.permute.xlu0 %v986_v0  ;;  %967 = vset.pattern.permute.xlu1 %v986_v0  ;;  %s165_s17 = scalar_lea.vmem %s1107_s0, %s945_s14  ;;  %vm459_vm5 = vcmask 908288   ;;  %v972_v22 = vld [vmem:[%s1108_s1 + $0x18] sm:$0xff]   ;;  %v971_v26 = vld [vmem:[%s1108_s1 + $0x10] sm:$0xff]   ;;  %vm529_vm6 = vcmask 900096   ;;  %vm599_vm7 = vcmask 785408   ;;  %v974_v32 = vld [vmem:[%s1108_s1 + $0x28] sm:$0xff]  }
   0xe   : > { %v172_v1 = vld [vmem:[%s165_s17] sm:$0xff]  ;;  %vm669_vm8 = vcmask 777216   ;;  %vm739_vm9 = vcmask 769024   ;;  %v976_v42 = vld [vmem:[%s1108_s1 + $0x38] sm:$0xff]   ;;  %v975_v46 = vld [vmem:[%s1108_s1 + $0x30] sm:$0xff]   ;;  %vm829_vm10 = vcmask 1043456  }
   0xf   : > { %v176_v2 = vpack.c.bf16 %v172_v1, %v172_v1  ;;  %v174_v3 = vcombine.high %v172_v1, %v172_v1  ;;  %v973_v36 = vld [vmem:[%s1108_s1 + $0x20] sm:$0xff]   ;;  %vm830_vm11 = vcmask 769028  }
  0x10   : > { %v977_v48 = vld [vmem:[%s1108_s1 + $0x40] sm:$0xff]   ;;  %vm831_vm12 = vmor %vm830_vm11, %vm829_vm10 }
  0x11   : > { %315 = vrot.lane.b32.xlu1 %v176_v2, %s987_s18  ;;  %190 = vrot.lane.b32.xlu0 %v176_v2, %s988_s19  ;;  %v177_v4 = vpack.c.bf16 %v174_v3, %v174_v3  ;;  %v259_v5 = vsel %vm200_vm0, %v176_v2, 0 }
  0x13   : > { %904 = vmatprep.subr.msk.bf16.mxu1 %vm200_vm0, %v177_v4 }
  0x14   : > { %279 = vmatpush1.bf16.msra.mxu1 %v259_v5 }
  0x15   : > { %317 = vrot.lane.b32.xlu1 %v177_v4, %s987_s18  ;;  %192 = vrot.lane.b32.xlu0 %v177_v4, %s988_s19 }
  0x17   : > { %905 = vmatmul.mubr.msk.bf16.vlgmr.msra.gmra.mxu1 %vm196_vm1, %v970_v6 }
  0x18   : > { %432 = vmatprep.mubr.bf16.mxu1 %v986_v0 }
  0x19   : > { %387 = vrot.lane.b32.xlu1 %v177_v4, %s989_s22  ;;  %385 = vrot.lane.b32.xlu0 %v176_v2, %s989_s22 }
  0x1d   : > { %457 = vrot.lane.b32.xlu1 %v177_v4, %s990_s23  ;;  %455 = vrot.lane.b32.xlu0 %v176_v2, %s990_s23  ;;  %s946_s23 = sshll.u32 %s1112_s13, 4 }
  0x21   : > { %527 = vrot.lane.b32.xlu1 %v177_v4, %s991_s24  ;;  %525 = vrot.lane.b32.xlu0 %v176_v2, %s991_s24 }
  0x25   : > { %597 = vrot.lane.b32.xlu1 %v177_v4, %s992_s25  ;;  %595 = vrot.lane.b32.xlu0 %v176_v2, %s992_s25 }
  0x29   : > { %667 = vrot.lane.b32.xlu1 %v177_v4, %s993_s26  ;;  %665 = vrot.lane.b32.xlu0 %v176_v2, %s993_s26  ;;  %s170_s26 = scalar_lea.vmem %s1110_s3, %s946_s23 }
  0x2d   : > { %737 = vrot.lane.b32.xlu1 %v177_v4, %s994_s27  ;;  %735 = vrot.lane.b32.xlu0 %v176_v2, %s994_s27 }
  0x31   : > { %801 = vperm.xlu0 %966, %v797_v7   ;;  %806 = vperm.xlu1 %967, %v798_v8  }
  0x83   : > { %v316_v9 = vpop.permute.xlu1 %315  ;;  %v191_v10 = vpop.permute.xlu0 %190 }
  0x87   : > { %v318_v11 = vpop.permute.xlu1 %317  ;;  %v193_v12 = vpop.permute.xlu0 %192 }
  0x88   : > { %v320_v13 = vsel %vm319_vm2, %v316_v9, %v318_v11  ;;  %901 = vmatprep.subr.msk.bf16.mxu0 %vm200_vm0, %v193_v12  ;;  %v195_v14 = vsel %vm194_vm3, %v191_v10, %v193_v12 }
  0x89   : > { %v202_v15 = vsel %vm200_vm0, %v195_v14, 0  ;;  %v325_v17 = vsel %vm200_vm0, %v320_v13, 0 }
  0x8a   : > { %222 = vmatpush1.bf16.msra.mxu0 %v202_v15 }
  0x8b   : > { %909 = vmatprep.subr.msk.bf16.mxu0 %vm200_vm0, %v318_v11  ;;  %v388_v18 = vpop.permute.xlu1 %387  ;;  %v386_v19 = vpop.permute.xlu0 %385 }
  0x8c   : > { %v390_v20 = vsel %vm389_vm4, %v386_v19, %v388_v18  ;;  %914 = vmatprep.subr.msk.bf16.mxu1 %vm200_vm0, %v388_v18 }
  0x8d   : > { %902 = vmatmul.mubr.msk.bf16.vlgmr.msra.gmra.mxu0 %vm196_vm1, %v969_v16  ;;  %v395_v21 = vsel %vm200_vm0, %v390_v20, 0 }
  0x8e   : > { %345 = vmatpush1.bf16.msra.mxu0 %v325_v17  ;;  %415 = vmatpush1.bf16.msra.mxu1 %v395_v21 }
  0x8f   : > { %v458_v23 = vpop.permute.xlu1 %457  ;;  %v456_v24 = vpop.permute.xlu0 %455  ;;  %362 = vmatprep.mubr.bf16.mxu0 %v986_v0 }
  0x90   : > { %v460_v25 = vsel %vm459_vm5, %v456_v24, %v458_v23  ;;  %919 = vmatprep.subr.msk.bf16.mxu0 %vm200_vm0, %v458_v23 }
  0x91   : > { %915 = vmatmul.mubr.msk.bf16.vlgmr.msra.gmra.mxu1 %vm196_vm1, %v972_v22  ;;  %v465_v27 = vsel %vm200_vm0, %v460_v25, 0 }
  0x92   : > { %572 = vmatprep.mubr.bf16.mxu1 %v986_v0 }
  0x93   : > { %v528_v28 = vpop.permute.xlu1 %527  ;;  %v526_v29 = vpop.permute.xlu0 %525 }
  0x94   : > { %v530_v30 = vsel %vm529_vm6, %v526_v29, %v528_v28  ;;  %924 = vmatprep.subr.msk.bf16.mxu1 %vm200_vm0, %v528_v28 }
  0x95   : > { %910 = vmatmul.mubr.msk.bf16.vlgmr.msra.gmra.mxu0 %vm196_vm1, %v971_v26  ;;  %v535_v31 = vsel %vm200_vm0, %v530_v30, 0 }
  0x96   : > { %485 = vmatpush1.bf16.msra.mxu0 %v465_v27  ;;  %555 = vmatpush1.bf16.msra.mxu1 %v535_v31 }
  0x97   : > { %v598_v33 = vpop.permute.xlu1 %597  ;;  %v596_v34 = vpop.permute.xlu0 %595  ;;  %502 = vmatprep.mubr.bf16.mxu0 %v986_v0 }
  0x98   : > { %v600_v35 = vsel %vm599_vm7, %v596_v34, %v598_v33  ;;  %929 = vmatprep.subr.msk.bf16.mxu0 %vm200_vm0, %v598_v33 }
  0x99   : > { %925 = vmatmul.mubr.msk.bf16.vlgmr.msra.gmra.mxu1 %vm196_vm1, %v974_v32  ;;  %v605_v37 = vsel %vm200_vm0, %v600_v35, 0 }
  0x9a   : > { %712 = vmatprep.mubr.bf16.mxu1 %v986_v0 }
  0x9b   : > { %v668_v38 = vpop.permute.xlu1 %667  ;;  %v666_v39 = vpop.permute.xlu0 %665 }
  0x9c   : > { %v670_v40 = vsel %vm669_vm8, %v666_v39, %v668_v38  ;;  %934 = vmatprep.subr.msk.bf16.mxu1 %vm200_vm0, %v668_v38 }
  0x9d   : > { %920 = vmatmul.mubr.msk.bf16.vlgmr.msra.gmra.mxu0 %vm196_vm1, %v973_v36  ;;  %v675_v41 = vsel %vm200_vm0, %v670_v40, 0 }
  0x9e   : > { %625 = vmatpush1.bf16.msra.mxu0 %v605_v37  ;;  %695 = vmatpush1.bf16.msra.mxu1 %v675_v41 }
  0x9f   : > { %v738_v43 = vpop.permute.xlu1 %737  ;;  %v736_v44 = vpop.permute.xlu0 %735  ;;  %642 = vmatprep.mubr.bf16.mxu0 %v986_v0 }
  0xa0   : > { %v740_v45 = vsel %vm739_vm9, %v736_v44, %v738_v43  ;;  %939 = vmatprep.subr.msk.bf16.mxu0 %vm200_vm0, %v738_v43 }
  0xa1   : > { %935 = vmatmul.mubr.msk.bf16.vlgmr.msra.gmra.mxu1 %vm196_vm1, %v976_v42  ;;  %v745_v47 = vsel %vm200_vm0, %v740_v45, 0 }
  0xa5   : > { %930 = vmatmul.mubr.msk.bf16.vlgmr.msra.gmra.mxu0 %vm196_vm1, %v975_v46 }
  0xa6   : > { %765 = vmatpush1.bf16.msra.mxu0 %v745_v47  ;;  %782 = vmatprep.mubr.bf16.mxu0 %v986_v0 }
  0xac   : > { %v802_v39 = vpop.permute.xlu0 %801 }
  0xad   : > { %940 = vmatmul.mubr.msk.bf16.vlgmr.msra.gmra.mxu0 %vm196_vm1, %v977_v48 }
  0xd7   : > { %v298_v49 = vpop.f32.mrf.mxu1 }
  0xd9   : > { %v300_v50 = vpop.f32.mrf.mxu1 }
  0xdb   : > { %v302_v51 = vpop.f32.mrf.mxu1 }
  0xdd   : > { %v304_v53 = vpop.f32.mrf.mxu1 }
 0x14d   : > { %v241_v52 = vpop.f32.mrf.mxu0 }
 0x14e   : > { %v299_v1 = vadd.f32 %v298_v49, %v241_v52  ;;  %v807_v49 = vpop.permute.xlu1 %806 }
 0x14f   : > { %v243_v54 = vpop.f32.mrf.mxu0 }
 0x150   : > { %v301_v4 = vadd.f32 %v300_v50, %v243_v54 }
 0x151   : > { %v245_v55 = vpop.f32.mrf.mxu0  ;;  %v434_v56 = vpop.f32.mrf.mxu1 }
 0x152   : > { %v303_v8 = vadd.f32 %v302_v51, %v245_v55 }
 0x153   : > { %v247_v57 = vpop.f32.mrf.mxu0  ;;  %v436_v58 = vpop.f32.mrf.mxu1 }
 0x154   : > { %v305_v11 = vadd.f32 %v304_v53, %v247_v57 }
 0x155   : > { %v364_v59 = vpop.f32.mrf.mxu0  ;;  %v438_v60 = vpop.f32.mrf.mxu1 }
 0x156   : > { %v373_v5 = vadd.f32 %v364_v59, %v299_v1 }
 0x157   : > { %v366_v61 = vpop.f32.mrf.mxu0  ;;  %v440_v62 = vpop.f32.mrf.mxu1 }
 0x158   : > { %v374_v9 = vadd.f32 %v366_v61, %v301_v4  ;;  %v443_v12 = vadd.f32 %v434_v56, %v373_v5 }
 0x159   : > { %v368_v63 = vpop.f32.mrf.mxu0  ;;  %v574_v0 = vpop.f32.mrf.mxu1 }
 0x15a   : > { %v375_v13 = vadd.f32 %v368_v63, %v303_v8  ;;  %v444_v16 = vadd.f32 %v436_v58, %v374_v9 }
 0x15b   : > { %v370_v2 = vpop.f32.mrf.mxu0  ;;  %v576_v3 = vpop.f32.mrf.mxu1 }
 0x15c   : > { %v376_v17 = vadd.f32 %v370_v2, %v305_v11  ;;  %v445_v20 = vadd.f32 %v438_v60, %v375_v13 }
 0x15d   : > { %v504_v6 = vpop.f32.mrf.mxu0  ;;  %v578_v7 = vpop.f32.mrf.mxu1 }
 0x15e   : > { %v513_v18 = vadd.f32 %v504_v6, %v443_v12  ;;  %v446_v24 = vadd.f32 %v440_v62, %v376_v17 }
 0x15f   : > { %v506_v10 = vpop.f32.mrf.mxu0  ;;  %v580_v15 = vpop.f32.mrf.mxu1 }
 0x160   : > { %v514_v21 = vadd.f32 %v506_v10, %v444_v16  ;;  %v583_v25 = vadd.f32 %v574_v0, %v513_v18 }
 0x161   : > { %v508_v14 = vpop.f32.mrf.mxu0  ;;  %v714_v23 = vpop.f32.mrf.mxu1 }
 0x162   : > { %v515_v26 = vadd.f32 %v508_v14, %v445_v20  ;;  %v584_v28 = vadd.f32 %v576_v3, %v514_v21 }
 0x163   : > { %v510_v19 = vpop.f32.mrf.mxu0  ;;  %v716_v31 = vpop.f32.mrf.mxu1 }
 0x164   : > { %v516_v29 = vadd.f32 %v510_v19, %v446_v24  ;;  %v585_v33 = vadd.f32 %v578_v7, %v515_v26 }
 0x165   : > { %v644_v22 = vpop.f32.mrf.mxu0  ;;  %v718_v40 = vpop.f32.mrf.mxu1 }
 0x166   : > { %v653_v30 = vadd.f32 %v644_v22, %v583_v25  ;;  %v586_v36 = vadd.f32 %v580_v15, %v516_v29 }
 0x167   : > { %v646_v27 = vpop.f32.mrf.mxu0  ;;  %v720_v50 = vpop.f32.mrf.mxu1 }
 0x168   : > { %v654_v34 = vadd.f32 %v646_v27, %v584_v28  ;;  %v723_v37 = vadd.f32 %v714_v23, %v653_v30 }
 0x169   : > { %v648_v32 = vpop.f32.mrf.mxu0 }
 0x16a   : > { %v655_v38 = vadd.f32 %v648_v32, %v585_v33  ;;  %v724_v42 = vadd.f32 %v716_v31, %v654_v34 }
 0x16b   : > { %v650_v35 = vpop.f32.mrf.mxu0 }
 0x16c   : > { %v656_v43 = vadd.f32 %v650_v35, %v586_v36  ;;  %v725_v46 = vadd.f32 %v718_v40, %v655_v38 }
 0x16d   : > { %v784_v41 = vpop.f32.mrf.mxu0 }
 0x16e   : > { %v793_v44 = vadd.f32 %v784_v41, %v723_v37  ;;  %v726_v52 = vadd.f32 %v720_v50, %v656_v43 }
 0x16f   : > { %v786_v45 = vpop.f32.mrf.mxu0 }
 0x170   : > { %v794_v47 = vadd.f32 %v786_v45, %v724_v42  ;;  %v809_v48 = vadd.f32 %v802_v39, %v793_v44 }
 0x171   : > { %v788_v51 = vpop.f32.mrf.mxu0 }
 0x172   : > { %v810_v53 = vadd.f32 %v802_v39, %v794_v47  ;;  %v795_v54 = vadd.f32 %v788_v51, %v725_v46  ;;  %v813_v56 = vmax.f32 %v809_v48, 0.0 }
 0x173   : > { %v790_v55 = vpop.f32.mrf.mxu0 }
 0x174   : > { %v814_v57 = vmax.f32 %v810_v53, 0.0  ;;  %v811_v58 = vadd.f32 %v807_v49, %v795_v54  ;;  %v796_v59 = vadd.f32 %v790_v55, %v726_v52 }
 0x176   : > { %v947_v60 = vpack.c.bf16 %v814_v57, %v813_v56  ;;  %v812_v61 = vadd.f32 %v807_v49, %v796_v59  ;;  %v815_v62 = vmax.f32 %v811_v58, 0.0 }
 0x178   : > { %832 = vst.msk [vmem:[%s170_s26] sm:$0xff] %vm831_vm12, %v947_v60  ;;  %v816_v63 = vmax.f32 %v812_v61, 0.0 }
 0x17a   : > { %v948_v0 = vpack.c.bf16 %v816_v63, %v815_v62 }
 0x17c   : > { %833 = vst.msk [vmem:[%s170_s26 + $0x8] sm:$0xff] %vm831_vm12, %v948_v0 }
 0x17d PF: > { %s13_s12 = sadd.s32 1, %s984_s12  }
 0x17e   : > { %p10_p4 = scmp.ge.s32.totalorder %s13_s12, 4  }
 0x180   :  { %12 = sbr.rel (!%p10_p4) target bundleno = 1 (0x1), region = 70 }

</bundles_post_ra>
